<compile_context>
chip_gen: v7x
topology: tpu7x:2x2x1
jax: 0.10.0
libtpu: 0.0.40
codegen_flags: <defaults>
</compile_context>

<pallas_src>
import functools

import jax
import jax.numpy as jnp
from jax.experimental import pallas as pl
from jax.experimental.pallas import tpu as pltpu


# ----------------------------------------------------------------------------
# Activations (static Python dispatch -> specialized kernel)
# ----------------------------------------------------------------------------
def _apply_activation(h, name):
    if name == "relu":
        return jnp.maximum(h, 0.0)
    if name == "leaky_relu":
        return jnp.where(h >= 0.0, h, 0.01 * h)
    if name == "sigmoid":
        return jax.nn.sigmoid(h)
    if name == "tanh":
        return jnp.tanh(h)
    if name == "elu":
        return jnp.where(h >= 0.0, h, jnp.exp(h) - 1.0)
    if name == "selu":
        alpha = 1.6732632423543772
        scale = 1.0507009873554805
        return scale * jnp.where(h >= 0.0, h, alpha * (jnp.exp(h) - 1.0))
    raise ValueError(f"unknown activation {name}")


def _round_up(n, m):
    return ((n + m - 1) // m) * m


# ----------------------------------------------------------------------------
# Kernel: one batch-tile forward pass.
#   x_ref  : [tm, k_in]            input tile (feature dim NOT padded to 128)
#   w_ref  : [L, PAD+8, PAD]       hidden weights; row PAD of each layer = bias
#   hw_ref : [8, PAD]              fused head weights, TRANSPOSED (row j = head j)
#   hb_ref : [8, 1]                fused head biases
#   out_ref: [8, tm]               heads on sublanes, batch on lanes (lane-dense)
# ----------------------------------------------------------------------------
def _mol_nn_kernel(x_ref, w_ref, hw_ref, hb_ref, out_ref, *,
                   num_hidden, k_in, pad, activation):
    h = x_ref[...]  # [tm, k_in] f32
    for i in range(num_hidden):
        k_prev = k_in if i == 0 else pad
        w = w_ref[i, :k_prev, :]            # [k_prev, PAD]  (static slice, free)
        b = w_ref[i, pad:pad + 1, :]        # [1, PAD]       bias row
        h = jnp.dot(h, w, preferred_element_type=jnp.float32) + b
        # Dropout == identity in eval mode.
        h = _apply_activation(h, activation)

    # Fused heads, transposed output: [8, K] x [tm, K] -> [8, tm]
    # (contract last dims of both operands, like flash-attention's q.k^T).
    k_last = k_in if num_hidden == 0 else pad
    y = jax.lax.dot_general(
        hw_ref[:, :k_last], h,
        dimension_numbers=(((1,), (1,)), ((), ())),
        preferred_element_type=jnp.float32,
    )
    out_ref[...] = y + hb_ref[...]


# ----------------------------------------------------------------------------
# Parameter construction (nn.Linear-like uniform init, deterministic)
# ----------------------------------------------------------------------------
def init_params(key, input_size, hidden_layers):
    params = {"hidden": [], "heads": {}}
    prev = input_size
    for h_size in hidden_layers:
        key, kw, kb = jax.random.split(key, 3)
        bound = 1.0 / float(jnp.sqrt(prev))
        w = jax.random.uniform(kw, (prev, h_size), jnp.float32, -bound, bound)
        b = jax.random.uniform(kb, (1, h_size), jnp.float32, -bound, bound)
        params["hidden"].append((w, b))
        prev = h_size
    for name in ("homo", "lumo", "energy"):
        key, kw, kb = jax.random.split(key, 3)
        bound = 1.0 / float(jnp.sqrt(prev))
        w = jax.random.uniform(kw, (prev, 1), jnp.float32, -bound, bound)
        b = jax.random.uniform(kb, (1, 1), jnp.float32, -bound, bound)
        params["heads"][name] = (w, b)
    return params


# ----------------------------------------------------------------------------
# Host-side packing (done ONCE, outside the call path).
#   w_packed : [max(L,1), PAD+8, PAD]   hidden weights + bias row per layer
#   head_w   : [8, PAD]                 heads (homo/lumo/energy) on rows 0..2
#   head_b   : [8, 1]
# PAD stays 128 (all real widths <= 64; widening to 256 only wastes work).
# ----------------------------------------------------------------------------
def pack_params(params, input_size):
    hidden = params["hidden"]
    num_hidden = len(hidden)
    widths = [input_size] + [w.shape[1] for w, _ in hidden]
    pad = _round_up(max(widths), 128)
    k_in = _round_up(input_size, 8)

    w_packed = jnp.zeros((max(num_hidden, 1), pad + 8, pad), jnp.float32)
    for i, (w, b) in enumerate(hidden):
        w_packed = w_packed.at[i, : w.shape[0], : w.shape[1]].set(w)
        w_packed = w_packed.at[i, pad, : w.shape[1]].set(b.reshape(-1))

    prev = widths[-1]
    head_w = jnp.zeros((8, pad), jnp.float32)
    head_b = jnp.zeros((8, 1), jnp.float32)
    for j, name in enumerate(("homo", "lumo", "energy")):
        w, b = params["heads"][name]
        head_w = head_w.at[j, :prev].set(w.reshape(-1))
        head_b = head_b.at[j, 0].set(b.reshape(()))

    meta = dict(pad=pad, k_in=k_in, num_hidden=num_hidden)
    return w_packed, head_w, head_b, meta


# ----------------------------------------------------------------------------
# Batch-tile selection.
#   * small batches: one tile (kernel is step-overhead-bound anyway)
#   * large batches: >=2 tiles (v7x 2-TC sharding of the "parallel" axis),
#     tile a multiple of 128 lanes for the transposed output, capped at 4096
#     rows so double-buffered blocks fit v5e's 16 MiB scoped-VMEM default.
# ----------------------------------------------------------------------------
def _pick_tiling(batch):
    batch_pad = _round_up(max(batch, 8), 8)
    if batch_pad <= 1024:
        return batch_pad, batch_pad
    tm = min(4096, _round_up(pl.cdiv(batch_pad, 2), 128))
    batch_pad = _round_up(batch_pad, tm)
    return batch_pad, tm


# ----------------------------------------------------------------------------
# Forward: pad batch, 1-D parallel batch grid, VMEM-resident packed weights.
# ----------------------------------------------------------------------------
def _forward(x, w_packed, head_w, head_b, *, input_size, pad, k_in,
             num_hidden, activation):
    batch = x.shape[0]
    batch_pad, tm = _pick_tiling(batch)

    x_p = jnp.zeros((batch_pad, k_in), jnp.float32)
    x_p = x_p.at[:batch, :input_size].set(x.astype(jnp.float32))

    kernel = functools.partial(
        _mol_nn_kernel,
        num_hidden=num_hidden, k_in=k_in, pad=pad, activation=activation,
    )

    n_layers = w_packed.shape[0]
    out = pl.pallas_call(
        kernel,
        out_shape=jax.ShapeDtypeStruct((8, batch_pad), jnp.float32),
        grid=(batch_pad // tm,),
        in_specs=[
            pl.BlockSpec((tm, k_in), lambda i: (i, 0)),
            pl.BlockSpec((n_layers, pad + 8, pad), lambda i: (0, 0, 0)),
            pl.BlockSpec((8, pad), lambda i: (0, 0)),
            pl.BlockSpec((8, 1), lambda i: (0, 0)),
        ],
        out_specs=pl.BlockSpec((8, tm), lambda i: (0, i)),
        compiler_params=pltpu.CompilerParams(
            dimension_semantics=("parallel",)
        ),
    )(x_p, w_packed, head_w, head_b)

    heads = out[:3, :batch]          # one contiguous slice of the real rows
    homo = heads[0:1, :].T
    lumo = heads[1:2, :].T
    energy = heads[2:3, :].T
    return homo, lumo, energy


def build_mol_nn(params, input_size, activation="relu"):
    """Pack parameters once and return a jitted apply(x) -> (homo, lumo, energy)."""
    w_packed, head_w, head_b, meta = pack_params(params, input_size)
    fwd = functools.partial(
        _forward, input_size=input_size, activation=activation, **meta
    )

    @jax.jit
    def apply(x):
        return fwd(x, w_packed, head_w, head_b)

    return apply


# ----------------------------------------------------------------------------
# Pure-JAX reference for correctness check.
# ----------------------------------------------------------------------------
def molecular_property_nn_ref(x, params, activation="relu"):
    h = x.astype(jnp.float32)
    for w, b in params["hidden"]:
        h = _apply_activation(h @ w + b, activation)
    outs = []
    for name in ("homo", "lumo", "energy"):
        w, b = params["heads"][name]
        outs.append(h @ w + b)
    return tuple(outs)


if __name__ == "__main__":
    key = jax.random.PRNGKey(0)
    key, kx, kp, kx2 = jax.random.split(key, 4)

    # Small shapes consistent with the module: batch=8, input_size=32,
    # hidden_layers=[64, 32], activation='relu', dropout irrelevant (eval).
    batch = 8
    input_size = 32
    hidden_layers = [64, 32]
    activation = "relu"

    x = jax.random.normal(kx, (batch, input_size), jnp.float32)
    params = init_params(kp, input_size, hidden_layers)

    apply = build_mol_nn(params, input_size, activation)

    homo, lumo, energy = apply(x)
    jax.block_until_ready((homo, lumo, energy))

    homo_ref, lumo_ref, energy_ref = molecular_property_nn_ref(x, params, activation)
    assert homo.shape == (batch, 1) and lumo.shape == (batch, 1) and energy.shape == (batch, 1)
    assert jnp.allclose(homo, homo_ref, atol=1e-5)
    assert jnp.allclose(lumo, lumo_ref, atol=1e-5)
    assert jnp.allclose(energy, energy_ref, atol=1e-5)

    # Secondary check: exercises the multi-tile (grid > 1) path.
    batch2 = 2052
    x2 = jax.random.normal(kx2, (batch2, input_size), jnp.float32)
    h2, l2, e2 = apply(x2)
    jax.block_until_ready((h2, l2, e2))
    h2r, l2r, e2r = molecular_property_nn_ref(x2, params, activation)
    assert h2.shape == (batch2, 1)
    assert jnp.allclose(h2, h2r, atol=1e-5)
    assert jnp.allclose(l2, l2r, atol=1e-5)
    assert jnp.allclose(e2, e2r, atol=1e-5)

    print("KERNEL_OK")
</pallas_src>

<mosaic_0001>
module attributes {stable_mosaic.version = 11 : i64} {
  func.func @_mol_nn_kernel(%arg0: i32, %arg1: memref<8x32xf32, #tpu.memory_space<vmem>>, %arg2: memref<2x136x128xf32, #tpu.memory_space<vmem>>, %arg3: memref<8x128xf32, #tpu.memory_space<vmem>>, %arg4: memref<8x1xf32, #tpu.memory_space<vmem>>, %arg5: memref<8x8xf32, #tpu.memory_space<vmem>>) attributes {dimension_semantics = [#tpu.dimension_semantics<parallel>], iteration_bounds = array<i64: 1>, scalar_prefetch = 0 : i64, scratch_operands = 0 : i64, tpu.core_type = #tpu.core_type<tc>, window_params = [{transform_indices = @transform_0, window_bounds = array<i64: 8, 32>}, {pipeline_mode = #tpu.pipeline_mode<synchronous>, transform_indices = @transform_1, window_bounds = array<i64: 2, 136, 128>}, {pipeline_mode = #tpu.pipeline_mode<synchronous>, transform_indices = @transform_2, window_bounds = array<i64: 8, 128>}, {pipeline_mode = #tpu.pipeline_mode<synchronous>, transform_indices = @transform_3, window_bounds = array<i64: 8, 1>}, {transform_indices = @transform_4, window_bounds = array<i64: 8, 8>}]} {
    %c0 = arith.constant 0 : index
    %c0_0 = arith.constant 0 : index
    %0 = vector.load %arg1[%c0, %c0_0] : memref<8x32xf32, #tpu.memory_space<vmem>>, vector<8x32xf32>
    %c0_1 = arith.constant 0 : index
    %c0_2 = arith.constant 0 : index
    %c0_3 = arith.constant 0 : index
    %1 = vector.load %arg2[%c0_1, %c0_2, %c0_3] : memref<2x136x128xf32, #tpu.memory_space<vmem>>, vector<1x32x128xf32>
    %2 = vector.shape_cast %1 : vector<1x32x128xf32> to vector<32x128xf32>
    %c0_4 = arith.constant 0 : index
    %c128 = arith.constant 128 : index
    %c0_5 = arith.constant 0 : index
    %3 = vector.load %arg2[%c0_4, %c128, %c0_5] : memref<2x136x128xf32, #tpu.memory_space<vmem>>, vector<1x1x128xf32>
    %4 = vector.shape_cast %3 : vector<1x1x128xf32> to vector<1x128xf32>
    %cst = arith.constant dense<0.000000e+00> : vector<8x128xf32>
    %5 = tpu.matmul %0, %2, %cst {dimension_numbers = #tpu.dot_dimension_numbers<[1], [0], [0], [1], [0, 0, 1, 1], [], []>} : vector<8x32xf32>, vector<32x128xf32>, vector<8x128xf32> -> vector<8x128xf32>
    %6 = vector.broadcast %4 : vector<1x128xf32> to vector<8x128xf32>
    %7 = arith.addf %5, %6 : vector<8x128xf32>
    %cst_6 = arith.constant 0.000000e+00 : f32
    %8 = vector.broadcast %cst_6 : f32 to vector<8x128xf32>
    %9 = arith.maximumf %7, %8 : vector<8x128xf32>
    %c1 = arith.constant 1 : index
    %c0_7 = arith.constant 0 : index
    %c0_8 = arith.constant 0 : index
    %10 = vector.load %arg2[%c1, %c0_7, %c0_8] : memref<2x136x128xf32, #tpu.memory_space<vmem>>, vector<1x128x128xf32>
    %11 = vector.shape_cast %10 : vector<1x128x128xf32> to vector<128x128xf32>
    %c1_9 = arith.constant 1 : index
    %c128_10 = arith.constant 128 : index
    %c0_11 = arith.constant 0 : index
    %12 = vector.load %arg2[%c1_9, %c128_10, %c0_11] : memref<2x136x128xf32, #tpu.memory_space<vmem>>, vector<1x1x128xf32>
    %13 = vector.shape_cast %12 : vector<1x1x128xf32> to vector<1x128xf32>
    %cst_12 = arith.constant dense<0.000000e+00> : vector<8x128xf32>
    %14 = tpu.matmul %9, %11, %cst_12 {dimension_numbers = #tpu.dot_dimension_numbers<[1], [0], [0], [1], [0, 0, 1, 1], [], []>} : vector<8x128xf32>, vector<128x128xf32>, vector<8x128xf32> -> vector<8x128xf32>
    %15 = vector.broadcast %13 : vector<1x128xf32> to vector<8x128xf32>
    %16 = arith.addf %14, %15 : vector<8x128xf32>
    %cst_13 = arith.constant 0.000000e+00 : f32
    %17 = vector.broadcast %cst_13 : f32 to vector<8x128xf32>
    %18 = arith.maximumf %16, %17 : vector<8x128xf32>
    %c0_14 = arith.constant 0 : index
    %c0_15 = arith.constant 0 : index
    %19 = vector.load %arg3[%c0_14, %c0_15] : memref<8x128xf32, #tpu.memory_space<vmem>>, vector<8x128xf32>
    %cst_16 = arith.constant dense<0.000000e+00> : vector<8x8xf32>
    %20 = tpu.matmul %19, %18, %cst_16 {dimension_numbers = #tpu.dot_dimension_numbers<[1], [1], [0], [0], [0, 0, 1, 0], [], []>} : vector<8x128xf32>, vector<8x128xf32>, vector<8x8xf32> -> vector<8x8xf32>
    %c0_17 = arith.constant 0 : index
    %c0_18 = arith.constant 0 : index
    %21 = vector.load %arg4[%c0_17, %c0_18] : memref<8x1xf32, #tpu.memory_space<vmem>>, vector<8x1xf32>
    %22 = vector.broadcast %21 : vector<8x1xf32> to vector<8x8xf32>
    %23 = arith.addf %20, %22 : vector<8x8xf32>
    %c0_19 = arith.constant 0 : index
    %c0_20 = arith.constant 0 : index
    %24 = vector.load %arg5[%c0_19, %c0_20] : memref<8x8xf32, #tpu.memory_space<vmem>>, vector<8x8xf32>
    tpu.vector_store %arg5[%c0_19, %c0_20], %23 {strides = array<i32>} : memref<8x8xf32, #tpu.memory_space<vmem>>, vector<8x8xf32>,
    return
  }
  func.func @transform_0(%arg0: i32) -> (i32, i32) {
    %c0_i32 = arith.constant 0 : i32
    %c0_i32_0 = arith.constant 0 : i32
    return %arg0, %c0_i32 : i32, i32
  }
  func.func @transform_1(%arg0: i32) -> (i32, i32, i32) {
    %c0_i32 = arith.constant 0 : i32
    %c0_i32_0 = arith.constant 0 : i32
    %c0_i32_1 = arith.constant 0 : i32
    %c0_i32_2 = arith.constant 0 : i32
    return %c0_i32, %c0_i32_0, %c0_i32_1 : i32, i32, i32
  }
  func.func @transform_2(%arg0: i32) -> (i32, i32) {
    %c0_i32 = arith.constant 0 : i32
    %c0_i32_0 = arith.constant 0 : i32
    %c0_i32_1 = arith.constant 0 : i32
    return %c0_i32, %c0_i32_0 : i32, i32
  }
  func.func @transform_3(%arg0: i32) -> (i32, i32) {
    %c0_i32 = arith.constant 0 : i32
    %c0_i32_0 = arith.constant 0 : i32
    %c0_i32_1 = arith.constant 0 : i32
    return %c0_i32, %c0_i32_0 : i32, i32
  }
  func.func @transform_4(%arg0: i32) -> (i32, i32) {
    %c0_i32 = arith.constant 0 : i32
    %c0_i32_0 = arith.constant 0 : i32
    return %c0_i32, %arg0 : i32, i32
  }
}

</mosaic_0001>

<bundles_post_ra>
// kernel: apply.1
= control target key start
LH: loop header
LB: loop body
LE: loop exit
PB: predicated region body
PF: predicated region fallthrough
CT: control target
= control target key end

     0   :  { %9 = vsyncpa [#allocation3], 0  ;;  %s584_s0 = inlined_call_operand.hbm [shape: f32[8,32], index: 0, kind: input, shape index: {}]   ;;  %s585_s1 = inlined_call_operand.hbm [shape: f32[2,136,128], index: 1, kind: input, shape index: {}]   ;;  %s586_s2 = inlined_call_operand.hbm [shape: f32[8,128], index: 2, kind: input, shape index: {}]   ;;  %s587_s3 = inlined_call_operand.vmem [shape: f32[8,1], index: 3, kind: input, shape index: {}]   ;;  %s588_s4 = inlined_call_operand.vmem [shape: f32[8,8], index: 4, kind: output, shape index: {}]  }
   0x1   :  { %10 = vsyncpa [#allocation5], 0  ;;  %s505_s15 = smov [#allocation4]   ;;  %s435_s19 = scalar_lea.hbm %s585_s1, 4352 }
   0x2   :  { %s26_s16 = sshll.u32 %s505_s15, 4  ;;  %p436_p0 = scmp.ne.s32.totalorder %s585_s1, %s435_s19  ;;  %s27_s16 = int_to_ptr.vmem [resolvable:$true] %s26_s16 }
   0x3   :  { %p439_p1 = scmp.lt.u32.totalorder %s435_s19, %s585_s1 }
   0x5   :  { %p441_p2 = pnand %p439_p1, %p436_p0 }
   0x7   :  { %444 = shalt.err (!%p441_p2)
}
   0x8   :  { %s445_s24 = scalar_lea.vmem %s27_s16, 4352  ;;  %p450_p4 = scmp.lt.s32.totalorder %s27_s16, %s27_s16 }
   0x9   :  { %p446_p3 = scmp.ne.s32.totalorder %s27_s16, %s445_s24  ;;  %p451_p5 = scmp.lt.s32.totalorder %s445_s24, %s445_s24 }
   0xb   :  { %p452_p6 = por %p451_p5, %p450_p4 }
   0xd   :  { %p453_p7 = pnand %p452_p6, %p446_p3 }
   0xf   :  { %456 = shalt.err (!%p453_p7)
}
  0x10   :  { %s506_s25 = smov 128   ;;  %s507_s26 = smov 8  }
  0x11   :  { %32 = dma.hbm_to_vmem [thread:$0]  %s585_s1, 4352, %s27_s16, [#allocation5], %s506_s25, %s506_s25, %s507_s26  }
  0x12   :  { %s508_s29 = smov [#allocation2]   ;;  %s509_s5 = smov [#allocation6]  }
  0x13   :  { %s17_s30 = sshll.u32 %s508_s29, 4  ;;  %s39_s6 = sshll.u32 %s509_s5, 4  ;;  %s18_s30 = int_to_ptr.vmem [resolvable:$true] %s17_s30  ;;  %s40_s6 = int_to_ptr.vmem [resolvable:$true] %s39_s6 }
  0x14   :  { %s457_s9 = scalar_lea.hbm %s584_s0, 128 }
  0x15   :  { %p458_p8 = scmp.ne.s32.totalorder %s584_s0, %s457_s9  ;;  %p461_p9 = scmp.lt.u32.totalorder %s457_s9, %s584_s0 }
  0x17   :  { %p463_p10 = pnand %p461_p9, %p458_p8 }
  0x19   :  { %466 = shalt.err (!%p463_p10)
}
  0x1a   :  { %s467_s1 = scalar_lea.vmem %s18_s30, 128  ;;  %p472_p12 = scmp.lt.s32.totalorder %s18_s30, %s18_s30 }
  0x1b   :  { %p468_p11 = scmp.ne.s32.totalorder %s18_s30, %s467_s1  ;;  %p473_p13 = scmp.lt.s32.totalorder %s467_s1, %s467_s1 }
  0x1d   :  { %p474_p0 = por %p473_p13, %p472_p12 }
  0x1f   :  { %p475_p1 = pnand %p474_p0, %p468_p11 }
  0x21   :  { %478 = shalt.err (!%p475_p1)
}
  0x22   :  { %20 = dma.hbm_to_vmem [thread:$0]  %s584_s0, 128, %s18_s30, [#allocation3]  }
  0x23   :  { %s479_s18 = scalar_lea.hbm %s586_s2, 128 }
  0x24   :  { %p480_p2 = scmp.ne.s32.totalorder %s586_s2, %s479_s18  ;;  %p483_p3 = scmp.lt.u32.totalorder %s479_s18, %s586_s2 }
  0x26   :  { %p485_p4 = pnand %p483_p3, %p480_p2 }
  0x28   :  { %488 = shalt.err (!%p485_p4)
}
  0x29   :  { %s489_s23 = scalar_lea.vmem %s40_s6, 128  ;;  %p494_p6 = scmp.lt.s32.totalorder %s40_s6, %s40_s6 }
  0x2a   :  { %p490_p5 = scmp.ne.s32.totalorder %s40_s6, %s489_s23  ;;  %p495_p7 = scmp.lt.s32.totalorder %s489_s23, %s489_s23 }
  0x2c   :  { %p496_p8 = por %p495_p7, %p494_p6 }
  0x2e   :  { %p497_p9 = pnand %p496_p8, %p490_p5 }
  0x30   :  { %500 = shalt.err (!%p497_p9)
}
  0x31   :  { %42 = dma.hbm_to_vmem [thread:$0]  %s586_s2, 128, %s40_s6, [#allocation5]  }
  0x32   :  { %501 = dma.done.wait [#allocation3], 128  }
  0x33   :  { %502 = vsyncadd [#allocation3], 4294967168 }
  0x34   :  { %503 = dma.done.wait [#allocation5], 4480  }
  0x35   :  { %504 = vsyncadd [#allocation5], 4294962816  ;;  %v510_v0 = vmov 0.0|0.0   ;;  %vm511_vm0 = vmmov 0   ;;  %v512_v1 = vmov 0.0   ;;  %v55_v2 = vld [vmem:[#allocation4] sm:$0xff] }
  0x36   :  { %395 = vmatprep.subr.bf16.mxu0 %v510_v0  ;;  %352 = vmatprep.mubr.msk.f32.mxu0 %vm511_vm0, %v512_v1  ;;  %v56_v3 = vld [vmem:[#allocation4 + $0x8] sm:$0xff]  ;;  %v57_v4 = vld [vmem:[#allocation4 + $0x10] sm:$0xff]  ;;  %v58_v6 = vld [vmem:[#allocation4 + $0x18] sm:$0xff]  ;;  %vm64_vm1 = vcmask 261120   ;;  %v513_v39 = vmov 0   ;;  %vm309_vm2 = vcmask 64512  }
  0x37   :  { %401 = vmatprep.subr.bf16.mxu1 %v510_v0  ;;  %387 = vmatprep.mubr.msk.f32.mxu1 %vm511_vm0, %v512_v1  ;;  %v396_v5 = vpack.c.bf16 %v56_v3, %v55_v2  ;;  %v140_v7 = vld [vmem:[#allocation4 + $0x88] sm:$0xff]  ;;  %v141_v8 = vld [vmem:[#allocation4 + $0x90] sm:$0xff]  ;;  %v142_v9 = vld [vmem:[#allocation4 + $0x98] sm:$0xff]  ;;  %v399_v11 = vpack.c.bf16 %v58_v6, %v57_v4 }
  0x38   :  { %v143_v10 = vld [vmem:[#allocation4 + $0xa0] sm:$0xff]  ;;  %v402_v12 = vpack.c.bf16 %v141_v8, %v140_v7  ;;  %v144_v14 = vld [vmem:[#allocation4 + $0xa8] sm:$0xff]  ;;  %v145_v15 = vld [vmem:[#allocation4 + $0xb0] sm:$0xff]  ;;  %434 = vset.pattern.permute.xlu0 %v513_v39 }
  0x39   :  { %397 = vmatpush3.bf16.msra.mxu0 %v396_v5  ;;  %v405_v13 = vpack.c.bf16 %v143_v10, %v142_v9  ;;  %v54_v16 = vld [vmem:[#allocation2] sm:$0xff]  ;;  %v408_v17 = vpack.c.bf16 %v145_v15, %v144_v14  ;;  %v147_v19 = vld [vmem:[#allocation4 + $0xc0] sm:$0xff]  ;;  %v148_v21 = vld [vmem:[#allocation4 + $0xc8] sm:$0xff] }
  0x3a   :  { %398 = vmatprep.subr.bf16.mxu0 %v510_v0  ;;  %403 = vmatpush3.bf16.msra.mxu1 %v402_v12  ;;  %v146_v18 = vld [vmem:[#allocation4 + $0xb8] sm:$0xff]  ;;  %v149_v22 = vld [vmem:[#allocation4 + $0xd0] sm:$0xff]  ;;  %v151_v25 = vld [vmem:[#allocation4 + $0xe0] sm:$0xff] }
  0x3b   :  { %404 = vmatprep.subr.bf16.mxu1 %v510_v0  ;;  %v411_v20 = vpack.c.bf16 %v147_v19, %v146_v18  ;;  %v414_v23 = vpack.c.bf16 %v149_v22, %v148_v21  ;;  %v150_v24 = vld [vmem:[#allocation4 + $0xd8] sm:$0xff]  ;;  %v152_v27 = vld [vmem:[#allocation4 + $0xe8] sm:$0xff]  ;;  %v153_v28 = vld [vmem:[#allocation4 + $0xf0] sm:$0xff] }
  0x3c   :  { %v417_v26 = vpack.c.bf16 %v151_v25, %v150_v24  ;;  %v420_v29 = vpack.c.bf16 %v153_v28, %v152_v27  ;;  %v154_v30 = vld [vmem:[#allocation4 + $0xf8] sm:$0xff]  ;;  %v155_v31 = vld [vmem:[#allocation4 + $0x100] sm:$0xff]  ;;  %v233_v38 = vld [vmem:[%s587_s3] sm:$0xff] }
  0x3d   :  { %400 = vmatpush3.bf16.msra.mxu0 %v399_v11  ;;  %v423_v32 = vpack.c.bf16 %v155_v31, %v154_v30  ;;  %v317_v33 = vld [vmem:[#allocation4 + $0x80] ss:$0 sm:$0xff]  ;;  %236 = vperm.xlu0 %434, %v233_v38   ;;  %v319_v40 = vld [vmem:[#allocation4 + $0x108] ss:$0 sm:$0xff]  ;;  %v232_v45 = vld [vmem:[#allocation6] sm:$0xff] }
  0x3e   :  { %390 = vmatprep.subr.mxu0 %v512_v1  ;;  %406 = vmatpush3.bf16.msra.mxu1 %v405_v13 }
  0x3f   :  { %407 = vmatprep.subr.bf16.mxu1 %v510_v0 }
  0x40   :  { %353 = vmatmul.mubr.msk.f32.vlgmr.msra.gmra.mrb[0].mxu0 %vm64_vm1, %v54_v16 }
  0x41   :  { %392 = vmatprep.mubr.msk.f32.mxu0 %vm511_vm0, %v512_v1 }
  0x42   :  { %409 = vmatpush3.bf16.msra.mxu1 %v408_v17 }
  0x43   :  { %410 = vmatprep.subr.bf16.mxu1 %v510_v0 }
  0x46   :  { %412 = vmatpush3.bf16.msra.mxu1 %v411_v20 }
  0x47   :  { %413 = vmatprep.subr.bf16.mxu1 %v510_v0 }
  0x4a   :  { %415 = vmatpush3.bf16.msra.mxu1 %v414_v23 }
  0x4b   :  { %416 = vmatprep.subr.bf16.mxu1 %v510_v0 }
  0x4e   :  { %418 = vmatpush3.bf16.msra.mxu1 %v417_v26 }
  0x4f   :  { %419 = vmatprep.subr.bf16.mxu1 %v510_v0 }
  0x52   :  { %421 = vmatpush3.bf16.msra.mxu1 %v420_v29 }
  0x53   :  { %422 = vmatprep.subr.bf16.mxu1 %v510_v0 }
  0x56   :  { %424 = vmatpush3.bf16.msra.mxu1 %v423_v32 }
  0xbc   :  { %v237_v46 = vpop.permute.xlu0 %236 }
 0x113   :  { %v134_v34 = vpop.f32.mrb[0].mxu0 }
 0x114   :  { %v135_v35 = vadd.f32 %v317_v33, %v134_v34  ;;  %v354_v36 = vpop.f32.mrb[1].mxu0 }
 0x116   :  { %v138_v37 = vmax.f32 %v135_v35, 0.0 }
 0x118   :  { %388 = vmatmul.mubr.f32.vlgmr.msra.gmra.mrb[0].mxu1 %v138_v37 }
 0x1eb   :  { %v227_v41 = vpop.f32.mrb[0].mxu1 }
 0x1ec   :  { %v228_v42 = vadd.f32 %v319_v40, %v227_v41  ;;  %v389_v43 = vpop.f32.mrb[1].mxu1 }
 0x1ee   :  { %v231_v44 = vmax.f32 %v228_v42, 0.0 }
 0x1f0   :  { %391 = vmatpush3.xpose.msra.mxu0 %v231_v44 }
 0x1f3   :  { %393 = vmatmul.mubr.f32.vlgmr.msra.gmra.mrb[2].mxu0 %v232_v45 }
 0x2c6   :  { %v305_v47 = vpop.f32.mrb[2].mxu0 }
 0x2c7   :  { %v306_v48 = vadd.f32 %v305_v47, %v237_v46  ;;  %v394_v49 = vpop.f32.mrb[3].mxu0 }
 0x2c9   :  { %310 = vst.msk [vmem:[%s588_s4] sm:$0xff] %vm309_vm2, %v306_v48 }
 0x2ca   :  { %315 = vsyncpa [#allocation3], 1 }
 0x2cb   :  { %316 = vsyncpa [#allocation5], 1 }

</bundles_post_ra>
